<compile_context>
chip_gen: v6e
topology: v6e:2x2x1
jax: 0.10.0
libtpu: 0.0.40
codegen_flags: <defaults>
</compile_context>

<pallas_src>
import functools

import jax
import jax.numpy as jnp
from jax import lax
from jax.experimental import pallas as pl
from jax.experimental.pallas import tpu as pltpu


# ----------------------------- configuration ------------------------------ #
BATCH = 8
NUM_DENSE = 4                       # len(dense_features)
NUM_EMBEDDINGS = [10, 11, 12, 13]   # vocab sizes -> 4 sparse fields
N_SPARSE = len(NUM_EMBEDDINGS)
EMB_DIM = 8
REPR_SIZE = 16
HIDDEN_UNITS = [32, 16]             # before the insert(0, dnn_in) in __init__
H1, H2 = HIDDEN_UNITS
D1 = NUM_DENSE + REPR_SIZE                           # 20, fm_1st_order_dense input
FM2_W = N_SPARSE * EMB_DIM                           # 32
DNN_IN = FM2_W + D1                                  # 52
TGT_W = NUM_DENSE + N_SPARSE                         # 8 columns of target_x

_offsets, _acc = [], 0
for _v in NUM_EMBEDDINGS:
    _offsets.append(_acc)
    _acc += _v
OFFSETS = tuple(_offsets)            # row offset of each field in the packed table
V_TOTAL = _acc                       # 46 total embedding rows

K_OH = 128                           # one-hot width (V_TOTAL padded to one lane group)
GATHER_W = FM2_W + EMB_DIM + 1       # 41: [fm2(32) | sum_e(8) | fm1_sum(1)]
GATHER_W_PAD = 48                    # padded to a multiple of 8 for the w0g matmul
VEC_LEN = TGT_W + REPR_SIZE + H2 + H1 + H2 + 1 + 1   # 90: [w1d_t|w1d_r|wf|b0|b1|b1d|bf]


# ------------------------------ Pallas kernel ------------------------------ #
def _decoder_kernel(
    gidx_ref,    # VMEM (bt, NS) int32   clamped ids + field offsets (one-hot columns)
    repr_ref,    # VMEM (bt, R)
    tgt_ref,     # VMEM (bt, TGT_W)      first ND columns dense, rest sparse-id floats
    table_ref,   # VMEM (K_OH, GATHER_W_PAD) packed gather table (see pack_params)
    w0g_ref,     # VMEM (GATHER_W_PAD, H1)   layer-0 weight for the gathered slab
    w0t_ref,     # VMEM (TGT_W, H1)          layer-0 weight for target_x (id rows zero)
    w0r_ref,     # VMEM (R, H1)              layer-0 weight for representation
    w1_ref,      # VMEM (H1, H2)
    vec_ref,     # VMEM (1, VEC_LEN)         packed [w1d_t|w1d_r|wf|b0|b1|b1d|bf]
    out_ref,     # VMEM (bt, 1)
    *, n_sparse, emb_dim, repr_size, tgt_w, h1, h2, k_oh, fm2_w,
):
    f32 = jnp.float32
    btile = out_ref.shape[0]

    # ---- one-hot MXU gather (replaces the serial scalar gather loop) --------
    col = lax.broadcasted_iota(jnp.int32, (btile, k_oh), 1)
    gidx = gidx_ref[...]                                   # (bt, NS) int32
    hot = col == gidx[:, 0:1]
    for fi in range(1, n_sparse):
        hot = hot | (col == gidx[:, fi:fi + 1])
    onehot = hot.astype(f32)                               # (bt, K_OH), NS ones per row
    gathered = jnp.dot(onehot, table_ref[...],
                       preferred_element_type=f32)         # (bt, GATHER_W_PAD)

    fm2_flat = gathered[:, :fm2_w]                         # (bt, 32) per-field embeddings
    sum_e = gathered[:, fm2_w:fm2_w + emb_dim]             # (bt, 8)  field-summed embedding
    fm1_sp = gathered[:, fm2_w + emb_dim:fm2_w + emb_dim + 1]   # (bt, 1) summed fm1 weight

    # ---- unpack the small packed vector slab --------------------------------
    vec = vec_ref[...]                                     # (1, VEC_LEN)
    o = 0
    w1d_t = vec[:, o:o + tgt_w]; o += tgt_w                # (1, 8)  (id lanes zeroed)
    w1d_r = vec[:, o:o + repr_size]; o += repr_size        # (1, 16)
    wf_row = vec[:, o:o + h2]; o += h2                     # (1, 16)
    b0 = vec[:, o:o + h1]; o += h1                         # (1, 32)
    b1 = vec[:, o:o + h2]; o += h2                         # (1, 16)
    b1d = vec[:, o:o + 1]; o += 1                          # (1, 1)
    bf = vec[:, o:o + 1]                                   # (1, 1)

    tgt = tgt_ref[...]                                     # (bt, TGT_W)
    rep = repr_ref[...]                                    # (bt, R)

    # ---- FM first order: VPU multiply + lane reduce --------------------------
    fm_1st = (fm1_sp
              + jnp.sum(tgt * w1d_t, axis=1, keepdims=True)
              + jnp.sum(rep * w1d_r, axis=1, keepdims=True)
              + b1d)

    # ---- FM second order: 0.5 * ((sum_i e_i)^2 - sum_i e_i^2) ----------------
    fm_2nd = 0.5 * (jnp.sum(sum_e * sum_e, axis=1, keepdims=True)
                    - jnp.sum(fm2_flat * fm2_flat, axis=1, keepdims=True))

    # ---- DNN: layer-0 as three per-slab matmuls (no scratch slab), layer-1,
    #      final linear on the VPU --------------------------------------------
    h = (jnp.dot(gathered, w0g_ref[...], preferred_element_type=f32)
         + jnp.dot(tgt, w0t_ref[...], preferred_element_type=f32)
         + jnp.dot(rep, w0r_ref[...], preferred_element_type=f32)
         + b0)
    h = jnp.maximum(h, 0.0)
    h = jnp.dot(h, w1_ref[...], preferred_element_type=f32) + b1
    h = jnp.maximum(h, 0.0)
    dnn_out = jnp.sum(h * wf_row, axis=1, keepdims=True) + bf

    out_ref[...] = (fm_1st + fm_2nd + dnn_out).astype(out_ref.dtype)


# ------------------------------ packing (one-time) -------------------------- #
def pack_params(params):
    """One-time packing of module parameters into kernel slabs (not per-call)."""
    table = jnp.zeros((K_OH, GATHER_W_PAD), jnp.float32)
    for fi in range(N_SPARSE):
        rows = slice(OFFSETS[fi], OFFSETS[fi] + NUM_EMBEDDINGS[fi])
        emb = params["fm2_emb"][fi]                        # (V_fi, E)
        w1s = params["fm1_emb"][fi]                        # (V_fi, 1)
        table = table.at[rows, fi * EMB_DIM:(fi + 1) * EMB_DIM].set(emb)   # per-field fm2
        table = table.at[rows, FM2_W:FM2_W + EMB_DIM].set(emb)             # sum_e block
        table = table.at[rows, FM2_W + EMB_DIM].set(w1s[:, 0])             # fm1 sum col

    w0 = params["w0"]                                      # (52, H1): [fm2 | dense | repr]
    w0g = jnp.zeros((GATHER_W_PAD, H1), jnp.float32).at[:FM2_W].set(w0[:FM2_W])
    w0t = jnp.zeros((TGT_W, H1), jnp.float32).at[:NUM_DENSE].set(
        w0[FM2_W:FM2_W + NUM_DENSE])
    w0r = w0[FM2_W + NUM_DENSE:]

    w1d = params["w1d"]                                    # (D1, 1)
    w1d_t = jnp.zeros((1, TGT_W), jnp.float32).at[0, :NUM_DENSE].set(w1d[:NUM_DENSE, 0])
    w1d_r = w1d[NUM_DENSE:, 0].reshape(1, REPR_SIZE)

    vec = jnp.concatenate(
        [w1d_t, w1d_r,
         params["wf"].reshape(1, H2),
         params["b0"].reshape(1, H1),
         params["b1"].reshape(1, H2),
         params["b1d"].reshape(1, 1),
         params["bf"].reshape(1, 1)], axis=1)              # (1, VEC_LEN)

    offsets = jnp.array(OFFSETS, jnp.int32).reshape(1, N_SPARSE)
    return {"table": table, "w0g": w0g, "w0t": w0t, "w0r": w0r,
            "w1": params["w1"], "vec": vec, "offsets": offsets}


# ------------------------------ wrapper ------------------------------------ #
def _pick_btile(b):
    for t in (1024, 512, 256, 128):
        if b >= t and b % t == 0:
            return t
    return b


def deterministic_decoder_pallas(representation, target_x, packed):
    """Forward pass of DeterministicDecoder.

    representation : (B, REPR_SIZE) float32
    target_x       : (B, NUM_DENSE + N_SPARSE) float32 (sparse cols are int-valued)
    packed         : output of pack_params(params)
    """
    b = target_x.shape[0]
    btile = _pick_btile(b)
    n_tiles = b // btile

    vocab = jnp.array(NUM_EMBEDDINGS, jnp.int32).reshape(1, N_SPARSE)
    ids = target_x[:, NUM_DENSE:].astype(jnp.int32)
    ids = jnp.clip(ids, 0, vocab - 1)                      # safe against OOB ids
    gidx = ids + packed["offsets"]                         # (B, NS) one-hot columns

    kernel = functools.partial(
        _decoder_kernel, n_sparse=N_SPARSE, emb_dim=EMB_DIM, repr_size=REPR_SIZE,
        tgt_w=TGT_W, h1=H1, h2=H2, k_oh=K_OH, fm2_w=FM2_W)

    grid_spec = pltpu.PrefetchScalarGridSpec(
        num_scalar_prefetch=0,
        grid=(n_tiles,),
        in_specs=[
            pl.BlockSpec((btile, N_SPARSE), lambda i: (i, 0)),
            pl.BlockSpec((btile, REPR_SIZE), lambda i: (i, 0)),
            pl.BlockSpec((btile, TGT_W), lambda i: (i, 0)),
            pl.BlockSpec((K_OH, GATHER_W_PAD), lambda i: (0, 0)),
            pl.BlockSpec((GATHER_W_PAD, H1), lambda i: (0, 0)),
            pl.BlockSpec((TGT_W, H1), lambda i: (0, 0)),
            pl.BlockSpec((REPR_SIZE, H1), lambda i: (0, 0)),
            pl.BlockSpec((H1, H2), lambda i: (0, 0)),
            pl.BlockSpec((1, VEC_LEN), lambda i: (0, 0)),
        ],
        out_specs=pl.BlockSpec((btile, 1), lambda i: (i, 0)),
    )

    return pl.pallas_call(
        kernel,
        out_shape=jax.ShapeDtypeStruct((b, 1), jnp.float32),
        grid_spec=grid_spec,
        compiler_params=pltpu.CompilerParams(dimension_semantics=("parallel",)),
    )(gidx, representation, target_x,
      packed["table"], packed["w0g"], packed["w0t"], packed["w0r"],
      packed["w1"], packed["vec"])


# ------------------------------ reference (pure JAX) ------------------------ #
def deterministic_decoder_ref(representation, target_x, params):
    hp = lax.Precision.HIGHEST
    dense_raw = target_x[:, :NUM_DENSE]
    sparse_idx = target_x[:, NUM_DENSE:].astype(jnp.int32)
    dense_input = jnp.concatenate([dense_raw, representation], axis=-1)

    fm1_sparse = jnp.concatenate(
        [jnp.take(params["fm1_emb"][i], sparse_idx[:, i], axis=0) for i in range(N_SPARSE)],
        axis=1,
    )
    fm1 = (jnp.sum(fm1_sparse, axis=1, keepdims=True)
           + jnp.dot(dense_input, params["w1d"], precision=hp) + params["b1d"])

    fm2 = jnp.stack(
        [jnp.take(params["fm2_emb"][i], sparse_idx[:, i], axis=0) for i in range(N_SPARSE)],
        axis=1,
    )  # (B, NS, E)
    sum_embed = jnp.sum(fm2, axis=1)
    sub = 0.5 * (sum_embed * sum_embed - jnp.sum(fm2 * fm2, axis=1))
    fm2_part = jnp.sum(sub, axis=1, keepdims=True)

    dnn_in = jnp.concatenate([fm2.reshape(fm2.shape[0], -1), dense_input], axis=-1)
    h = jnp.maximum(jnp.dot(dnn_in, params["w0"], precision=hp) + params["b0"], 0.0)
    h = jnp.maximum(jnp.dot(h, params["w1"], precision=hp) + params["b1"], 0.0)
    dnn_out = jnp.dot(h, params["wf"], precision=hp) + params["bf"]
    return fm1 + fm2_part + dnn_out


# ----------------------------------- main ---------------------------------- #
def _init_params(key):
    ks = jax.random.split(key, 16)
    params = {
        "fm1_emb": [
            jax.random.normal(ks[i], (NUM_EMBEDDINGS[i], 1), jnp.float32) * 0.1
            for i in range(N_SPARSE)
        ],
        "fm2_emb": [
            jax.random.normal(ks[4 + i], (NUM_EMBEDDINGS[i], EMB_DIM), jnp.float32) * 0.1
            for i in range(N_SPARSE)
        ],
        "w1d": jax.random.normal(ks[8], (D1, 1), jnp.float32) * 0.1,
        "b1d": jnp.zeros((1, 1), jnp.float32),
        "w0": jax.random.normal(ks[9], (DNN_IN, H1), jnp.float32) * 0.1,
        "b0": jax.random.normal(ks[10], (1, H1), jnp.float32) * 0.01,
        "w1": jax.random.normal(ks[11], (H1, H2), jnp.float32) * 0.1,
        "b1": jax.random.normal(ks[12], (1, H2), jnp.float32) * 0.01,
        "wf": jax.random.normal(ks[13], (H2, 1), jnp.float32) * 0.1,
        "bf": jnp.zeros((1, 1), jnp.float32),
    }
    return params


if __name__ == "__main__":
    key = jax.random.PRNGKey(0)
    k_rep, k_dense, k_sparse, k_params = jax.random.split(key, 4)

    params = _init_params(k_params)
    packed = pack_params(params)   # one-time packing (amortized across calls)

    representation = jax.random.normal(k_rep, (BATCH, REPR_SIZE), jnp.float32)
    dense_part = jax.random.normal(k_dense, (BATCH, NUM_DENSE), jnp.float32)
    sparse_part = jnp.stack(
        [
            jax.random.randint(jax.random.fold_in(k_sparse, i), (BATCH,), 0, NUM_EMBEDDINGS[i])
            for i in range(N_SPARSE)
        ],
        axis=1,
    ).astype(jnp.float32)
    target_x = jnp.concatenate([dense_part, sparse_part], axis=1)   # (B, 4 + 4)

    out = jax.jit(deterministic_decoder_pallas)(representation, target_x, packed)
    out = jax.block_until_ready(out)

    ref = deterministic_decoder_ref(representation, target_x, params)
    assert out.shape == (BATCH, 1)
    assert jnp.allclose(out, ref, atol=1e-4, rtol=1e-4), (out, ref)

    print("KERNEL_OK")
</pallas_src>

<mosaic_0001>
module attributes {stable_mosaic.version = 11 : i64} {
  func.func @_decoder_kernel(%arg0: i32, %arg1: memref<8x4xi32, #tpu.memory_space<vmem>>, %arg2: memref<8x16xf32, #tpu.memory_space<vmem>>, %arg3: memref<8x8xf32, #tpu.memory_space<vmem>>, %arg4: memref<128x48xf32, #tpu.memory_space<vmem>>, %arg5: memref<48x32xf32, #tpu.memory_space<vmem>>, %arg6: memref<8x32xf32, #tpu.memory_space<vmem>>, %arg7: memref<16x32xf32, #tpu.memory_space<vmem>>, %arg8: memref<32x16xf32, #tpu.memory_space<vmem>>, %arg9: memref<1x90xf32, #tpu.memory_space<vmem>>, %arg10: memref<8x1xf32, #tpu.memory_space<vmem>>) attributes {dimension_semantics = [#tpu.dimension_semantics<parallel>], iteration_bounds = array<i64: 1>, scalar_prefetch = 0 : i64, scratch_operands = 0 : i64, tpu.core_type = #tpu.core_type<tc>, window_params = [{transform_indices = @transform_0, window_bounds = array<i64: 8, 4>}, {transform_indices = @transform_1, window_bounds = array<i64: 8, 16>}, {transform_indices = @transform_2, window_bounds = array<i64: 8, 8>}, {pipeline_mode = #tpu.pipeline_mode<synchronous>, transform_indices = @transform_3, window_bounds = array<i64: 128, 48>}, {pipeline_mode = #tpu.pipeline_mode<synchronous>, transform_indices = @transform_4, window_bounds = array<i64: 48, 32>}, {pipeline_mode = #tpu.pipeline_mode<synchronous>, transform_indices = @transform_5, window_bounds = array<i64: 8, 32>}, {pipeline_mode = #tpu.pipeline_mode<synchronous>, transform_indices = @transform_6, window_bounds = array<i64: 16, 32>}, {pipeline_mode = #tpu.pipeline_mode<synchronous>, transform_indices = @transform_7, window_bounds = array<i64: 32, 16>}, {pipeline_mode = #tpu.pipeline_mode<synchronous>, transform_indices = @transform_8, window_bounds = array<i64: 1, 90>}, {transform_indices = @transform_9, window_bounds = array<i64: 8, 1>}]} {
    %0 = tpu.iota {dimensions = array<i32: 1>} : vector<8x128xi32>
    %c0 = arith.constant 0 : index
    %c0_0 = arith.constant 0 : index
    %1 = vector.load %arg1[%c0, %c0_0] : memref<8x4xi32, #tpu.memory_space<vmem>>, vector<8x4xi32>
    %2 = vector.extract_strided_slice %1 {offsets = [0, 0], sizes = [8, 1], strides = [1, 1]} : vector<8x4xi32> to vector<8x1xi32>
    %3 = vector.broadcast %2 : vector<8x1xi32> to vector<8x128xi32>
    %4 = arith.cmpi eq, %0, %3 : vector<8x128xi32>
    %5 = vector.extract_strided_slice %1 {offsets = [0, 1], sizes = [8, 1], strides = [1, 1]} : vector<8x4xi32> to vector<8x1xi32>
    %6 = vector.broadcast %5 : vector<8x1xi32> to vector<8x128xi32>
    %7 = arith.cmpi eq, %0, %6 : vector<8x128xi32>
    %8 = arith.ori %4, %7 : vector<8x128xi1>
    %9 = vector.extract_strided_slice %1 {offsets = [0, 2], sizes = [8, 1], strides = [1, 1]} : vector<8x4xi32> to vector<8x1xi32>
    %10 = vector.broadcast %9 : vector<8x1xi32> to vector<8x128xi32>
    %11 = arith.cmpi eq, %0, %10 : vector<8x128xi32>
    %12 = arith.ori %8, %11 : vector<8x128xi1>
    %13 = vector.extract_strided_slice %1 {offsets = [0, 3], sizes = [8, 1], strides = [1, 1]} : vector<8x4xi32> to vector<8x1xi32>
    %14 = vector.broadcast %13 : vector<8x1xi32> to vector<8x128xi32>
    %15 = arith.cmpi eq, %0, %14 : vector<8x128xi32>
    %16 = arith.ori %12, %15 : vector<8x128xi1>
    %17 = arith.extui %16 : vector<8x128xi1> to vector<8x128xi32>
    %18 = arith.sitofp %17 : vector<8x128xi32> to vector<8x128xf32>
    %c0_1 = arith.constant 0 : index
    %c0_2 = arith.constant 0 : index
    %19 = vector.load %arg4[%c0_1, %c0_2] : memref<128x48xf32, #tpu.memory_space<vmem>>, vector<128x48xf32>
    %cst = arith.constant dense<0.000000e+00> : vector<8x48xf32>
    %20 = tpu.matmul %18, %19, %cst {dimension_numbers = #tpu.dot_dimension_numbers<[1], [0], [0], [1], [0, 0, 1, 1], [], []>} : vector<8x128xf32>, vector<128x48xf32>, vector<8x48xf32> -> vector<8x48xf32>
    %21 = vector.extract_strided_slice %20 {offsets = [0, 0], sizes = [8, 32], strides = [1, 1]} : vector<8x48xf32> to vector<8x32xf32>
    %22 = vector.extract_strided_slice %20 {offsets = [0, 32], sizes = [8, 8], strides = [1, 1]} : vector<8x48xf32> to vector<8x8xf32>
    %23 = vector.extract_strided_slice %20 {offsets = [0, 40], sizes = [8, 1], strides = [1, 1]} : vector<8x48xf32> to vector<8x1xf32>
    %c0_3 = arith.constant 0 : index
    %c0_4 = arith.constant 0 : index
    %24 = vector.load %arg9[%c0_3, %c0_4] : memref<1x90xf32, #tpu.memory_space<vmem>>, vector<1x90xf32>
    %25 = vector.extract_strided_slice %24 {offsets = [0, 0], sizes = [1, 8], strides = [1, 1]} : vector<1x90xf32> to vector<1x8xf32>
    %26 = vector.extract_strided_slice %24 {offsets = [0, 8], sizes = [1, 16], strides = [1, 1]} : vector<1x90xf32> to vector<1x16xf32>
    %27 = vector.extract_strided_slice %24 {offsets = [0, 24], sizes = [1, 16], strides = [1, 1]} : vector<1x90xf32> to vector<1x16xf32>
    %28 = vector.extract_strided_slice %24 {offsets = [0, 40], sizes = [1, 32], strides = [1, 1]} : vector<1x90xf32> to vector<1x32xf32>
    %29 = vector.extract_strided_slice %24 {offsets = [0, 72], sizes = [1, 16], strides = [1, 1]} : vector<1x90xf32> to vector<1x16xf32>
    %30 = vector.extract_strided_slice %24 {offsets = [0, 88], sizes = [1, 1], strides = [1, 1]} : vector<1x90xf32> to vector<1x1xf32>
    %31 = vector.extract_strided_slice %24 {offsets = [0, 89], sizes = [1, 1], strides = [1, 1]} : vector<1x90xf32> to vector<1x1xf32>
    %c0_5 = arith.constant 0 : index
    %c0_6 = arith.constant 0 : index
    %32 = vector.load %arg3[%c0_5, %c0_6] : memref<8x8xf32, #tpu.memory_space<vmem>>, vector<8x8xf32>
    %c0_7 = arith.constant 0 : index
    %c0_8 = arith.constant 0 : index
    %33 = vector.load %arg2[%c0_7, %c0_8] : memref<8x16xf32, #tpu.memory_space<vmem>>, vector<8x16xf32>
    %34 = vector.broadcast %25 : vector<1x8xf32> to vector<8x8xf32>
    %35 = arith.mulf %32, %34 : vector<8x8xf32>
    %cst_9 = arith.constant dense<0.000000e+00> : vector<8xf32>
    %36 = vector.multi_reduction <add>, %35, %cst_9 [1] : vector<8x8xf32> to vector<8xf32>
    %37 = vector.shape_cast %36 : vector<8xf32> to vector<8x1xf32>
    %38 = arith.addf %23, %37 : vector<8x1xf32>
    %39 = vector.broadcast %26 : vector<1x16xf32> to vector<8x16xf32>
    %40 = arith.mulf %33, %39 : vector<8x16xf32>
    %cst_10 = arith.constant dense<0.000000e+00> : vector<8xf32>
    %41 = vector.multi_reduction <add>, %40, %cst_10 [1] : vector<8x16xf32> to vector<8xf32>
    %42 = vector.shape_cast %41 : vector<8xf32> to vector<8x1xf32>
    %43 = arith.addf %38, %42 : vector<8x1xf32>
    %44 = vector.broadcast %30 : vector<1x1xf32> to vector<8x1xf32>
    %45 = arith.addf %43, %44 : vector<8x1xf32>
    %46 = arith.mulf %22, %22 : vector<8x8xf32>
    %cst_11 = arith.constant dense<0.000000e+00> : vector<8xf32>
    %47 = vector.multi_reduction <add>, %46, %cst_11 [1] : vector<8x8xf32> to vector<8xf32>
    %48 = vector.shape_cast %47 : vector<8xf32> to vector<8x1xf32>
    %49 = arith.mulf %21, %21 : vector<8x32xf32>
    %cst_12 = arith.constant dense<0.000000e+00> : vector<8xf32>
    %50 = vector.multi_reduction <add>, %49, %cst_12 [1] : vector<8x32xf32> to vector<8xf32>
    %51 = vector.shape_cast %50 : vector<8xf32> to vector<8x1xf32>
    %52 = arith.subf %48, %51 : vector<8x1xf32>
    %cst_13 = arith.constant 5.000000e-01 : f32
    %53 = vector.broadcast %cst_13 : f32 to vector<8x1xf32>
    %54 = arith.mulf %53, %52 : vector<8x1xf32>
    %c0_14 = arith.constant 0 : index
    %c0_15 = arith.constant 0 : index
    %55 = vector.load %arg5[%c0_14, %c0_15] : memref<48x32xf32, #tpu.memory_space<vmem>>, vector<48x32xf32>
    %cst_16 = arith.constant dense<0.000000e+00> : vector<8x32xf32>
    %56 = tpu.matmul %20, %55, %cst_16 {dimension_numbers = #tpu.dot_dimension_numbers<[1], [0], [0], [1], [0, 0, 1, 1], [], []>} : vector<8x48xf32>, vector<48x32xf32>, vector<8x32xf32> -> vector<8x32xf32>
    %c0_17 = arith.constant 0 : index
    %c0_18 = arith.constant 0 : index
    %57 = vector.load %arg6[%c0_17, %c0_18] : memref<8x32xf32, #tpu.memory_space<vmem>>, vector<8x32xf32>
    %cst_19 = arith.constant dense<0.000000e+00> : vector<8x32xf32>
    %58 = tpu.matmul %32, %57, %cst_19 {dimension_numbers = #tpu.dot_dimension_numbers<[1], [0], [0], [1], [0, 0, 1, 1], [], []>} : vector<8x8xf32>, vector<8x32xf32>, vector<8x32xf32> -> vector<8x32xf32>
    %59 = arith.addf %56, %58 : vector<8x32xf32>
    %c0_20 = arith.constant 0 : index
    %c0_21 = arith.constant 0 : index
    %60 = vector.load %arg7[%c0_20, %c0_21] : memref<16x32xf32, #tpu.memory_space<vmem>>, vector<16x32xf32>
    %cst_22 = arith.constant dense<0.000000e+00> : vector<8x32xf32>
    %61 = tpu.matmul %33, %60, %cst_22 {dimension_numbers = #tpu.dot_dimension_numbers<[1], [0], [0], [1], [0, 0, 1, 1], [], []>} : vector<8x16xf32>, vector<16x32xf32>, vector<8x32xf32> -> vector<8x32xf32>
    %62 = arith.addf %59, %61 : vector<8x32xf32>
    %63 = vector.broadcast %28 : vector<1x32xf32> to vector<8x32xf32>
    %64 = arith.addf %62, %63 : vector<8x32xf32>
    %cst_23 = arith.constant 0.000000e+00 : f32
    %65 = vector.broadcast %cst_23 : f32 to vector<8x32xf32>
    %66 = arith.maximumf %64, %65 : vector<8x32xf32>
    %c0_24 = arith.constant 0 : index
    %c0_25 = arith.constant 0 : index
    %67 = vector.load %arg8[%c0_24, %c0_25] : memref<32x16xf32, #tpu.memory_space<vmem>>, vector<32x16xf32>
    %cst_26 = arith.constant dense<0.000000e+00> : vector<8x16xf32>
    %68 = tpu.matmul %66, %67, %cst_26 {dimension_numbers = #tpu.dot_dimension_numbers<[1], [0], [0], [1], [0, 0, 1, 1], [], []>} : vector<8x32xf32>, vector<32x16xf32>, vector<8x16xf32> -> vector<8x16xf32>
    %69 = vector.broadcast %29 : vector<1x16xf32> to vector<8x16xf32>
    %70 = arith.addf %68, %69 : vector<8x16xf32>
    %cst_27 = arith.constant 0.000000e+00 : f32
    %71 = vector.broadcast %cst_27 : f32 to vector<8x16xf32>
    %72 = arith.maximumf %70, %71 : vector<8x16xf32>
    %73 = vector.broadcast %27 : vector<1x16xf32> to vector<8x16xf32>
    %74 = arith.mulf %72, %73 : vector<8x16xf32>
    %cst_28 = arith.constant dense<0.000000e+00> : vector<8xf32>
    %75 = vector.multi_reduction <add>, %74, %cst_28 [1] : vector<8x16xf32> to vector<8xf32>
    %76 = vector.shape_cast %75 : vector<8xf32> to vector<8x1xf32>
    %77 = vector.broadcast %31 : vector<1x1xf32> to vector<8x1xf32>
    %78 = arith.addf %76, %77 : vector<8x1xf32>
    %79 = arith.addf %45, %54 : vector<8x1xf32>
    %80 = arith.addf %79, %78 : vector<8x1xf32>
    %c0_29 = arith.constant 0 : index
    %c0_30 = arith.constant 0 : index
    %81 = vector.load %arg10[%c0_29, %c0_30] : memref<8x1xf32, #tpu.memory_space<vmem>>, vector<8x1xf32>
    tpu.vector_store %arg10[%c0_29, %c0_30], %80 {strides = array<i32>} : memref<8x1xf32, #tpu.memory_space<vmem>>, vector<8x1xf32>,
    return
  }
  func.func @transform_0(%arg0: i32) -> (i32, i32) {
    %c0_i32 = arith.constant 0 : i32
    %c0_i32_0 = arith.constant 0 : i32
    return %arg0, %c0_i32 : i32, i32
  }
  func.func @transform_1(%arg0: i32) -> (i32, i32) {
    %c0_i32 = arith.constant 0 : i32
    %c0_i32_0 = arith.constant 0 : i32
    return %arg0, %c0_i32 : i32, i32
  }
  func.func @transform_2(%arg0: i32) -> (i32, i32) {
    %c0_i32 = arith.constant 0 : i32
    %c0_i32_0 = arith.constant 0 : i32
    return %arg0, %c0_i32 : i32, i32
  }
  func.func @transform_3(%arg0: i32) -> (i32, i32) {
    %c0_i32 = arith.constant 0 : i32
    %c0_i32_0 = arith.constant 0 : i32
    %c0_i32_1 = arith.constant 0 : i32
    return %c0_i32, %c0_i32_0 : i32, i32
  }
  func.func @transform_4(%arg0: i32) -> (i32, i32) {
    %c0_i32 = arith.constant 0 : i32
    %c0_i32_0 = arith.constant 0 : i32
    %c0_i32_1 = arith.constant 0 : i32
    return %c0_i32, %c0_i32_0 : i32, i32
  }
  func.func @transform_5(%arg0: i32) -> (i32, i32) {
    %c0_i32 = arith.constant 0 : i32
    %c0_i32_0 = arith.constant 0 : i32
    %c0_i32_1 = arith.constant 0 : i32
    return %c0_i32, %c0_i32_0 : i32, i32
  }
  func.func @transform_6(%arg0: i32) -> (i32, i32) {
    %c0_i32 = arith.constant 0 : i32
    %c0_i32_0 = arith.constant 0 : i32
    %c0_i32_1 = arith.constant 0 : i32
    return %c0_i32, %c0_i32_0 : i32, i32
  }
  func.func @transform_7(%arg0: i32) -> (i32, i32) {
    %c0_i32 = arith.constant 0 : i32
    %c0_i32_0 = arith.constant 0 : i32
    %c0_i32_1 = arith.constant 0 : i32
    return %c0_i32, %c0_i32_0 : i32, i32
  }
  func.func @transform_8(%arg0: i32) -> (i32, i32) {
    %c0_i32 = arith.constant 0 : i32
    %c0_i32_0 = arith.constant 0 : i32
    %c0_i32_1 = arith.constant 0 : i32
    return %c0_i32, %c0_i32_0 : i32, i32
  }
  func.func @transform_9(%arg0: i32) -> (i32, i32) {
    %c0_i32 = arith.constant 0 : i32
    %c0_i32_0 = arith.constant 0 : i32
    return %arg0, %c0_i32 : i32, i32
  }
}

</mosaic_0001>

<bundles_post_ra>
// kernel: deterministic_decoder_pallas.1
= control target key start
LH: loop header
LB: loop body
LE: loop exit
PB: predicated region body
PF: predicated region fallthrough
CT: control target
= control target key end

     0   :  { %v657_v0 = vmov 0   ;;  %v658_v2 = vmov 2   ;;  %v659_v4 = vmov 0.0   ;;  %v660_v6 = vmov 1   ;;  %s663_s20 = smov 88   ;;  %s664_s26 = smov 104   ;;  %s893_s0 = inlined_call_operand.vmem [shape: s32[8,4], index: 0, kind: input, shape index: {}]   ;;  %s894_s3 = inlined_call_operand.vmem [shape: f32[128,48], index: 3, kind: input, shape index: {}]   ;;  %s895_s5 = inlined_call_operand.vmem [shape: f32[8,32], index: 5, kind: input, shape index: {}]   ;;  %s896_s2 = inlined_call_operand.vmem [shape: f32[8,8], index: 2, kind: input, shape index: {}]   ;;  %s897_s4 = inlined_call_operand.vmem [shape: f32[48,32], index: 4, kind: input, shape index: {}]   ;;  %s898_s8 = inlined_call_operand.vmem [shape: f32[1,90], index: 8, kind: input, shape index: {}]   ;;  %s899_s6 = inlined_call_operand.vmem [shape: f32[16,32], index: 6, kind: input, shape index: {}]   ;;  %s900_s1 = inlined_call_operand.vmem [shape: f32[8,16], index: 1, kind: input, shape index: {}]   ;;  %s901_s7 = inlined_call_operand.vmem [shape: f32[32,16], index: 7, kind: input, shape index: {}]   ;;  %s902_s9 = inlined_call_operand.vmem [shape: f32[8,1], index: 9, kind: output, shape index: {}]  }
   0x1   :  { %652 = vset.pattern.permute.xlu0 %v657_v0  ;;  %v34_v1 = vld [vmem:[%s893_s0] sm:$0xff]  ;;  %654 = vset.pattern.permute.xlu1 %v658_v2  ;;  %v71_v3 = vld [vmem:[%s894_s3 + $0x78] sm:$0xff]  ;;  %v70_v5 = vld [vmem:[%s894_s3 + $0x70] sm:$0xff]  ;;  %v661_v7 = vmov 3   ;;  %vm662_vm0 = vmmov 0   ;;  %vm152_vm1 = vcmask 64512   ;;  %v32_v31 = vlaneseq }
   0x2   :  { %36 = vperm.xlu0 %652, %v34_v1   ;;  %45 = vperm.xlu1 %654, %v34_v1   ;;  %v69_v8 = vld [vmem:[%s894_s3 + $0x68] sm:$0xff]  ;;  %v190_v9 = vld [vmem:[%s895_s5] sm:$0xff]  ;;  %v67_v13 = vld [vmem:[%s894_s3 + $0x58] sm:$0xff]  ;;  %v665_v37 = vmov 1.0   ;;  %vm264_vm9 = vcmask 392192   ;;  %vm161_vm10 = vcmask 130048  }
   0x3   :  { %565 = vmatprep.subr.mxu0 %v659_v4  ;;  %600 = vmatprep.subr.mxu1 %v659_v4  ;;  %v745_v10 = vld [vmem:[%s896_s2] sm:$0xff]  ;;  %v189_v12 = vld [vmem:[%s897_s4 + $0x28] sm:$0xff]  ;;  %v66_v15 = vld [vmem:[%s894_s3 + $0x50] sm:$0xff]  ;;  %v33_v34 = vand.u32 127, %v32_v31  ;;  %s666_s17 = smov 96   ;;  %vm178_vm11 = vcmask 261120  }
   0x4   :  { %566 = vmatpush3.msra.mxu0 %v71_v3  ;;  %597 = vmatprep.mubr.msk.f32.mxu0 %vm662_vm0, %v659_v4  ;;  %v68_v11 = vld [vmem:[%s894_s3 + $0x60] sm:$0xff]  ;;  %v187_v16 = vld [vmem:[%s897_s4 + $0x18] sm:$0xff]  ;;  %v65_v17 = vld [vmem:[%s894_s3 + $0x48] sm:$0xff]  ;;  %s667_s2 = smov 56   ;;  %s668_s5 = smov 120   ;;  %vm518_vm12 = vcmask 7168  }
   0x5   :  { %567 = vmatprep.subr.mxu0 %v659_v4  ;;  %601 = vmatpush3.msra.mxu1 %v190_v9  ;;  %v188_v14 = vld [vmem:[%s897_s4 + $0x20] sm:$0xff]  ;;  %v186_v18 = vld [vmem:[%s897_s4 + $0x10] sm:$0xff]  ;;  %v63_v21 = vld [vmem:[%s894_s3 + $0x38] sm:$0xff]  ;;  %s670_s24 = smov 79  }
   0x6   :  { %653 = vset.pattern.permute.xlu0 %v660_v6  ;;  %655 = vset.pattern.permute.xlu1 %v661_v7  ;;  %v64_v19 = vld [vmem:[%s894_s3 + $0x40] sm:$0xff]  ;;  %v185_v22 = vld [vmem:[%s897_s4 + $0x8] sm:$0xff]  ;;  %v62_v23 = vld [vmem:[%s894_s3 + $0x30] sm:$0xff] }
   0x7   :  { %40 = vperm.xlu0 %653, %v34_v1   ;;  %50 = vperm.xlu1 %655, %v34_v1   ;;  %v789_v20 = vld [vmem:[%s898_s8] ss:$0 sm:$0xff]  ;;  %v61_v25 = vld [vmem:[%s894_s3 + $0x28] sm:$0xff]  ;;  %v59_v27 = vld [vmem:[%s894_s3 + $0x18] sm:$0xff] }
   0x8   :  { %568 = vmatpush3.msra.mxu0 %v70_v5  ;;  %602 = vmatprep.mubr.msk.f32.mxu1 %vm662_vm0, %v659_v4  ;;  %v184_v24 = vld [vmem:[%s897_s4] sm:$0xff]  ;;  %v58_v28 = vld [vmem:[%s894_s3 + $0x10] sm:$0xff]  ;;  %v57_v29 = vld [vmem:[%s894_s3 + $0x8] sm:$0xff]  ;;  %v151_v44 = vmul.f32 %v789_v20, %v745_v10 }
   0x9   :  { %569 = vmatprep.subr.mxu0 %v659_v4  ;;  %603 = vmatmul.mubr.msk.f32.vlgmr.msra.gmra.mxu1 %vm152_vm1, %v745_v10  ;;  %v60_v26 = vld [vmem:[%s894_s3 + $0x20] sm:$0xff]  ;;  %v339_v38 = vld [vmem:[%s899_s6 + $0x8] sm:$0xff]  ;;  %v422_v49 = vld [vmem:[%s901_s7 + $0x18] sm:$0xff] }
   0xa   :  { %570 = vmatpush3.msra.mxu0 %v69_v8  ;;  %605 = vmatprep.subr.mxu1 %v659_v4  ;;  %v56_v30 = vld [vmem:[%s894_s3] sm:$0xff]  ;;  %v153_v45 = vsel %vm152_vm1, %v151_v44, 0.0  ;;  %v421_v50 = vld [vmem:[%s901_s7 + $0x10] sm:$0xff]  ;;  %v420_v51 = vld [vmem:[%s901_s7 + $0x8] sm:$0xff] }
   0xb   :  { %571 = vmatprep.subr.mxu0 %v659_v4  ;;  %606 = vmatpush3.msra.mxu1 %v189_v12  ;;  %v338_v41 = vld [vmem:[%s899_s6] sm:$0xff] }
   0xc   :  { %572 = vmatpush3.msra.mxu0 %v68_v11  ;;  %607 = vmatprep.subr.mxu1 %v659_v4  ;;  %v144_v43 = vld [vmem:[%s900_s1] sm:$0xff] }
   0xd   :  { %573 = vmatprep.subr.mxu0 %v659_v4  ;;  %608 = vmatpush3.msra.mxu1 %v188_v14  ;;  %v419_v52 = vld [vmem:[%s901_s7] sm:$0xff]  ;;  %s669_s7 = smov 80  }
   0xe   :  { %574 = vmatpush3.msra.mxu0 %v67_v13  ;;  %609 = vmatprep.subr.mxu1 %v659_v4 }
   0xf   :  { %575 = vmatprep.subr.mxu0 %v659_v4  ;;  %610 = vmatpush3.msra.mxu1 %v187_v16 }
  0x10   :  { %576 = vmatpush3.msra.mxu0 %v66_v15  ;;  %611 = vmatprep.subr.mxu1 %v659_v4 }
  0x11   :  { %577 = vmatprep.subr.mxu0 %v659_v4  ;;  %612 = vmatpush3.msra.mxu1 %v186_v18 }
  0x12   :  { %578 = vmatpush3.msra.mxu0 %v65_v17  ;;  %414 = vrot.lane.b32.xlu1 %v789_v20, %s663_s20 }
  0x13   :  { %579 = vmatprep.subr.mxu0 %v659_v4  ;;  %613 = vmatprep.subr.mxu1 %v659_v4 }
  0x14   :  { %580 = vmatpush3.msra.mxu0 %v64_v19  ;;  %614 = vmatpush3.msra.mxu1 %v185_v22 }
  0x15   :  { %581 = vmatprep.subr.mxu0 %v659_v4  ;;  %615 = vmatprep.subr.mxu1 %v659_v4 }
  0x16   :  { %582 = vmatpush3.msra.mxu0 %v63_v21  ;;  %616 = vmatpush3.msra.mxu1 %v184_v24 }
  0x17   :  { %583 = vmatprep.subr.mxu0 %v659_v4  ;;  %500 = vrot.lane.b32.xlu1 %v789_v20, %s664_s26 }
  0x18   :  { %584 = vmatpush3.msra.mxu0 %v62_v23  ;;  %617 = vmatprep.mubr.msk.f32.mxu1 %vm662_vm0, %v659_v4 }
  0x19   :  { %585 = vmatprep.subr.mxu0 %v659_v4  ;;  %620 = vmatprep.subr.mxu1 %v659_v4 }
  0x1a   :  { %586 = vmatpush3.msra.mxu0 %v61_v25  ;;  %656 = vset.pattern.permute.xlu0 %v661_v7 }
  0x1b   :  { %587 = vmatprep.subr.mxu0 %v659_v4  ;;  %423 = vrot.lane.b32.xlu0 %v789_v20, %s667_s2 }
  0x1c   :  { %588 = vmatpush3.msra.mxu0 %v60_v26 }
  0x1d   :  { %589 = vmatprep.subr.mxu0 %v659_v4 }
  0x1e   :  { %590 = vmatpush3.msra.mxu0 %v59_v27 }
  0x1f   :  { %591 = vmatprep.subr.mxu0 %v659_v4  ;;  %157 = vrot.lane.b32.xlu0 %v789_v20, %s668_s5 }
  0x20   :  { %592 = vmatpush3.msra.mxu0 %v58_v28 }
  0x21   :  { %593 = vmatprep.subr.mxu0 %v659_v4 }
  0x22   :  { %594 = vmatpush3.msra.mxu0 %v57_v29 }
  0x23   :  { %595 = vmatprep.subr.mxu0 %v659_v4 }
  0x24   :  { %596 = vmatpush3.msra.mxu0 %v56_v30 }
  0x7d   :  { %v37_v32 = vpop.permute.xlu0 %36  ;;  %v46_v33 = vpop.permute.xlu1 %45 }
  0x7e   :  { %vm38_vm2 = vcmp.eq.s32.totalorder %v33_v34, %v37_v32  ;;  %vm47_vm5 = vcmp.eq.s32.totalorder %v33_v34, %v46_v33 }
  0x82   :  { %v41_v35 = vpop.permute.xlu0 %40  ;;  %v51_v36 = vpop.permute.xlu1 %50 }
  0x83   :  { %vm42_vm3 = vcmp.eq.s32.totalorder %v33_v34, %v41_v35  ;;  %vm52_vm4 = vcmp.eq.s32.totalorder %v33_v34, %v51_v36 }
  0x84   :  { %vm43_vm6 = vmor %vm38_vm2, %vm42_vm3 }
  0x85   :  { %vm48_vm7 = vmor %vm43_vm6, %vm47_vm5 }
  0x86   :  { %vm53_vm8 = vmor %vm48_vm7, %vm52_vm4  ;;  %v415_v58 = vpop.permute.xlu1 %414 }
  0x87   :  { %598 = vmatmul.mubr.msk.f32.vlgmr.msra.gmra.mxu0 %vm53_vm8, %v665_v37 }
  0x8d   :  { %v424_v62 = vpop.permute.xlu0 %423 }
  0x91   :  { %v158_v2 = vpop.permute.xlu0 %157 }
  0x92   :  { %v160_v6 = vmul.f32 %v158_v2, %v144_v43 }
  0x94   :  { %v162_v8 = vsel %vm161_vm10, %v160_v6, 0.0 }
  0xc9   :  { %v260_v47 = vpop.f32.mrf.mxu1 }
  0xcb   :  { %v604_v48 = vpop.f32.mrf.mxu1 }
 0x147   :  { %v843_v39 = vpop.f32.mrf.mxu0 }
 0x148   :  { %v170_v40 = vmul.f32 %v843_v39, %v843_v39  ;;  %618 = vmatmul.mubr.msk.f32.vlgmr.msra.gmra.mxu1 %vm264_vm9, %v843_v39 }
 0x149   :  { %621 = vmatpush3.msra.mxu1 %v339_v38  ;;  %v599_v42 = vpop.f32.mrf.mxu0  ;;  %624 = vmatprep.mubr.msk.f32.mxu1 %vm662_vm0, %v659_v4 }
 0x14a   :  { %622 = vmatprep.subr.mxu1 %v659_v4  ;;  %172 = vrot.lane.b32.xlu1 %v170_v40, %s666_s17  ;;  %v179_v46 = vsel %vm178_vm11, %v170_v40, 0.0 }
 0x14b   :  { %623 = vmatpush3.msra.mxu1 %v338_v41 }
 0x14c   :  { %625 = vmatmul.mubr.msk.f32.vlgmr.msra.gmra.mxu1 %vm161_vm10, %v144_v43  ;;  %627 = vmatprep.subr.mxu1 %v659_v4 }
 0x14d   :  { %635 = vmatprep.mubr.msk.f32.mxu1 %vm662_vm0, %v659_v4  ;;  %628 = vmatpush3.msra.mxu1 %v422_v49 }
 0x14e   :  { %629 = vmatprep.subr.mxu1 %v659_v4 }
 0x14f   :  { %630 = vmatpush3.msra.mxu1 %v421_v50 }
 0x150   :  { %631 = vmatprep.subr.mxu1 %v659_v4 }
 0x151   :  { %632 = vmatpush3.msra.mxu1 %v420_v51 }
 0x152   :  { %633 = vmatprep.subr.mxu1 %v659_v4  ;;  %v501_v4 = vpop.permute.xlu1 %500 }
 0x153   :  { %634 = vmatpush3.msra.mxu1 %v419_v52 }
 0x16e   :  { %154 = vadd.xlane.f32.xlu1 %v153_v45 }
 0x172   :  { %180 = vadd.xlane.f32.xlu1 %v179_v46 }
 0x1bc   :  { %v173_v9 = vpop.permute.xlu1 %172 }
 0x1bd   :  { %v175_v10 = vsel %vm152_vm1, %v173_v9, 0.0 }
 0x1f7   :  { %v155_v14 = vpop.xlane.xlu1 %154 }
 0x1f8   :  { %v156_v16 = vadd.f32 %v155_v14, %v843_v39 }
 0x1fb   :  { %v181_v17 = vpop.xlane.xlu1 %180 }
 0x208   :  { %v334_v53 = vpop.f32.mrf.mxu1 }
 0x209   :  { %v335_v55 = vadd.f32 %v334_v53, %v260_v47 }
 0x20a   :  { %v619_v54 = vpop.f32.mrf.mxu1 }
 0x20c   :  { %v409_v56 = vpop.f32.mrf.mxu1 }
 0x20d   :  { %v413_v57 = vadd.f32 %v409_v56, %v335_v55 }
 0x20e   :  { %v626_v59 = vpop.f32.mrf.mxu1 }
 0x20f   :  { %v417_v60 = vadd.f32 %v415_v58, %v413_v57 }
 0x211   :  { %v418_v61 = vmax.f32 %v417_v60, 0.0 }
 0x213   :  { %636 = vmatmul.mubr.msk.f32.vlgmr.msra.gmra.mxu1 %vm178_vm11, %v418_v61 }
 0x2d3   :  { %v495_v63 = vpop.f32.mrf.mxu1 }
 0x2d4   :  { %v496_v0 = vadd.f32 %v495_v63, %v424_v62 }
 0x2d5   :  { %v637_v1 = vpop.f32.mrf.mxu1 }
 0x2d6   :  { %v499_v3 = vmax.f32 %v496_v0, 0.0 }
 0x2d8   :  { %v503_v5 = vmul.f32 %v501_v4, %v499_v3 }
 0x2da   :  { %v504_v7 = vsel %vm161_vm10, %v503_v5, 0.0 }
 0x2db   :  { %505 = vadd.xlane.f32.xlu0 %v504_v7 }
 0x2df   :  { %163 = vadd.xlane.f32.xlu0 %v162_v8 }
 0x2e3   :  { %176 = vadd.xlane.f32.xlu0 %v175_v10 }
 0x2f9   :  { %166 = vrot.lane.b32.xlu0 %v789_v20, %s669_s7 }
 0x364   :  { %v506_v11 = vpop.xlane.xlu0 %505 }
 0x365   :  { %v507_v12 = vadd.f32 %v789_v20, %v506_v11 }
 0x367   :  { %510 = vrot.lane.b32.xlu1 %v507_v12, %s670_s24 }
 0x368   :  { %v164_v13 = vpop.xlane.xlu0 %163 }
 0x369   :  { %v165_v19 = vadd.f32 %v164_v13, %v156_v16 }
 0x36c   :  { %v177_v15 = vpop.xlane.xlu0 %176 }
 0x36d   :  { %v182_v21 = vsub.f32 %v177_v15, %v181_v17 }
 0x36f   :  { %v183_v23 = vmul.f32 0.5, %v182_v21 }
 0x370   :  { %v167_v18 = vpop.permute.xlu0 %166 }
 0x371   :  { %v169_v22 = vadd.f32 %v167_v18, %v165_v19 }
 0x373   :  { %v508_v24 = vadd.f32 %v183_v23, %v169_v22 }
 0x3d9   :  { %v511_v25 = vpop.permute.xlu1 %510 }
 0x3da   :  { %v513_v26 = vadd.f32 %v511_v25, %v508_v24 }
 0x3dc   :  { %515 = vrot.lane.b32.xlu1 %v513_v26, %s663_s20 }
 0x44e   :  { %v516_v20 = vpop.permute.xlu1 %515 }
 0x44f   :  { %519 = vst.msk [vmem:[%s902_s9] sm:$0xff] %vm518_vm12, %v516_v20 }

</bundles_post_ra>
